<compile_context>
chip_gen: v7x
topology: tpu7x:2x2x1
jax: 0.10.0
libtpu: 0.0.40
codegen_flags: <defaults>
</compile_context>

<pallas_src>
import functools

import jax
import jax.numpy as jnp
from jax.experimental import pallas as pl
from jax.experimental.pallas import tpu as pltpu

NUM_CLASS = 10  # args.num_class
HIDDEN = 512
LANE = 128

# Above this many total rows, two pallas_calls (re-reading ~0.65 MiB bf16
# weights once more) are cheaper than materializing a concatenated copy of all
# activations in HBM.
_CONCAT_ROW_THRESHOLD = 1024


def _classifier_kernel(x_ref, w1_ref, b1_ref, w2_ref, b2_ref, out_ref):
    # One (tb, 512) bf16 batch tile per grid step; weights stay VMEM-resident.
    h = jnp.dot(x_ref[...], w1_ref[...],
                preferred_element_type=jnp.float32)        # (tb, 512) f32 acc
    h = h + b1_ref[...]                                    # bias in f32
    h = h.astype(jnp.bfloat16)                             # bf16 into 2nd MXU op
    y = jnp.dot(h, w2_ref[...],
                preferred_element_type=jnp.float32)        # (tb, ncp) f32 acc
    y = y + b2_ref[...]
    out_ref[...] = y.astype(out_ref.dtype)                 # lane-dense f32 store


def _round_up(x, m):
    return ((x + m - 1) // m) * m


def _pick_tile(total, tile_batch):
    """Pick a batch tile: multiple of 16 (bf16 packing), >=2 tiles when possible."""
    tile_batch = max(16, _round_up(tile_batch, 16))
    if total >= 2 * tile_batch:
        return tile_batch
    # Small/medium batch: split roughly in half so v7x's 2nd TensorCore gets a
    # tile too (v5e/v6e are single-core; the extra tile only costs ~0.35 us).
    half = _round_up(max(1, -(-total // 2)), 16)
    return min(tile_batch, max(16, half))


def _run_tiles(x, w1, b1, w2p, b2p, tile_batch):
    """Apply Linear(512,512) -> Linear(512,ncp) to an (N, 512) bf16 batch."""
    total = x.shape[0]
    ncp = w2p.shape[1]
    tb = _pick_tile(total, tile_batch)
    num_tiles = pl.cdiv(total, tb)   # ragged last block is masked by Pallas

    cost = pl.CostEstimate(
        flops=2 * total * HIDDEN * (HIDDEN + ncp),
        transcendentals=0,
        bytes_accessed=(x.size * x.dtype.itemsize
                        + w1.size * w1.dtype.itemsize
                        + w2p.size * w2p.dtype.itemsize
                        + b1.size * b1.dtype.itemsize
                        + b2p.size * b2p.dtype.itemsize
                        + total * ncp * 4),
    )

    return pl.pallas_call(
        _classifier_kernel,
        out_shape=jax.ShapeDtypeStruct((total, ncp), jnp.float32),
        grid_spec=pltpu.PrefetchScalarGridSpec(
            num_scalar_prefetch=0,
            grid=(num_tiles,),
            in_specs=[
                pl.BlockSpec((tb, HIDDEN), lambda i: (i, 0)),      # x tile
                pl.BlockSpec((HIDDEN, HIDDEN), lambda i: (0, 0)),  # w1 (resident)
                pl.BlockSpec((1, HIDDEN), lambda i: (0, 0)),       # b1 (f32)
                pl.BlockSpec((HIDDEN, ncp), lambda i: (0, 0)),     # w2 padded
                pl.BlockSpec((1, ncp), lambda i: (0, 0)),          # b2 padded
            ],
            out_specs=pl.BlockSpec((tb, ncp), lambda i: (i, 0)),
        ),
        compiler_params=pltpu.CompilerParams(
            dimension_semantics=("parallel",)),
        cost_estimate=cost,
    )(x, w1, b1, w2p, b2p)


@functools.partial(jax.jit, static_argnames=("num_class", "tile_batch"))
def classifier_apply(src_feat, tar_feat, params, *, num_class, tile_batch=512):
    """Fused forward of Linear(512,512) -> Linear(512,num_class) for both inputs."""
    w1, b1, w2p, b2p = params          # prepared: bf16 weights, f32 biases, padded
    b_src = src_feat.shape[0]
    b_tar = tar_feat.shape[0]
    total = b_src + b_tar

    src_b = src_feat.astype(jnp.bfloat16)
    tar_b = tar_feat.astype(jnp.bfloat16)

    if total <= _CONCAT_ROW_THRESHOLD:
        # Small batch: fuse so weights are DMA'd once (weight traffic dominates).
        x = jnp.concatenate([src_b, tar_b], axis=0)
        out = _run_tiles(x, w1, b1, w2p, b2p, tile_batch)
        src_pred = out[:b_src, :num_class]
        tar_pred = out[b_src:total, :num_class]
    else:
        # Large batch: skip the concat HBM copy; two calls re-read only the
        # ~0.65 MiB bf16 weights.
        src_pred = _run_tiles(src_b, w1, b1, w2p, b2p, tile_batch)[:, :num_class]
        tar_pred = _run_tiles(tar_b, w1, b1, w2p, b2p, tile_batch)[:, :num_class]
    return src_pred, tar_pred


def init_params(key, num_class=NUM_CLASS):
    # Deterministic init mimicking nn.Linear's U(-1/sqrt(fan_in), 1/sqrt(fan_in)).
    k1, k2, k3, k4 = jax.random.split(key, 4)
    bound = 1.0 / jnp.sqrt(float(HIDDEN))
    w1 = jax.random.uniform(k1, (HIDDEN, HIDDEN), jnp.float32, -bound, bound)
    b1 = jax.random.uniform(k2, (1, HIDDEN), jnp.float32, -bound, bound)
    w2 = jax.random.uniform(k3, (HIDDEN, num_class), jnp.float32, -bound, bound)
    b2 = jax.random.uniform(k4, (1, num_class), jnp.float32, -bound, bound)
    return w1, b1, w2, b2


def prepare_params(w1, b1, w2, b2):
    """One-time prep: cast weights to bf16, pad layer-2 to 128 lanes, biases f32."""
    num_class = w2.shape[1]
    ncp = max(LANE, _round_up(num_class, LANE))
    w2p = jnp.pad(w2, ((0, 0), (0, ncp - num_class)))
    b2p = jnp.pad(b2, ((0, 0), (0, ncp - num_class)))
    return (w1.astype(jnp.bfloat16),
            b1.astype(jnp.float32),
            w2p.astype(jnp.bfloat16),
            b2p.astype(jnp.float32))


if __name__ == "__main__":
    key = jax.random.PRNGKey(0)
    kp, ks, kt = jax.random.split(key, 3)

    raw_params = init_params(kp, NUM_CLASS)
    params = jax.block_until_ready(prepare_params(*raw_params))

    B = 8  # small batch
    src_feat = jax.random.normal(ks, (B, HIDDEN), jnp.float32)
    tar_feat = jax.random.normal(kt, (B, HIDDEN), jnp.float32)

    src_pred, tar_pred = classifier_apply(src_feat, tar_feat, params,
                                          num_class=NUM_CLASS)
    jax.block_until_ready((src_pred, tar_pred))

    # Reference check in plain JAX (f32 weights); bf16 matmul => looser tolerance.
    w1, b1, w2, b2 = raw_params
    ref_src = (src_feat @ w1 + b1) @ w2 + b2
    ref_tar = (tar_feat @ w1 + b1) @ w2 + b2
    assert src_pred.shape == (B, NUM_CLASS) and tar_pred.shape == (B, NUM_CLASS)
    assert jnp.allclose(src_pred, ref_src, atol=5e-2, rtol=5e-2)
    assert jnp.allclose(tar_pred, ref_tar, atol=5e-2, rtol=5e-2)

    print("KERNEL_OK")
</pallas_src>

<mosaic_0001>
module attributes {stable_mosaic.version = 11 : i64} {
  func.func @_classifier_kernel(%arg0: i32, %arg1: memref<16x512xbf16, #tpu.memory_space<vmem>>, %arg2: memref<512x512xbf16, #tpu.memory_space<vmem>>, %arg3: memref<1x512xf32, #tpu.memory_space<vmem>>, %arg4: memref<512x128xbf16, #tpu.memory_space<vmem>>, %arg5: memref<1x128xf32, #tpu.memory_space<vmem>>, %arg6: memref<16x128xf32, #tpu.memory_space<vmem>>) attributes {dimension_semantics = [#tpu.dimension_semantics<parallel>], iteration_bounds = array<i64: 1>, scalar_prefetch = 0 : i64, scratch_operands = 0 : i64, tpu.core_type = #tpu.core_type<tc>, window_params = [{transform_indices = @transform_0, window_bounds = array<i64: 16, 512>}, {pipeline_mode = #tpu.pipeline_mode<synchronous>, transform_indices = @transform_1, window_bounds = array<i64: 512, 512>}, {pipeline_mode = #tpu.pipeline_mode<synchronous>, transform_indices = @transform_2, window_bounds = array<i64: 1, 512>}, {pipeline_mode = #tpu.pipeline_mode<synchronous>, transform_indices = @transform_3, window_bounds = array<i64: 512, 128>}, {pipeline_mode = #tpu.pipeline_mode<synchronous>, transform_indices = @transform_4, window_bounds = array<i64: 1, 128>}, {transform_indices = @transform_5, window_bounds = array<i64: 16, 128>}]} {
    %c0 = arith.constant 0 : index
    %c0_0 = arith.constant 0 : index
    %0 = vector.load %arg1[%c0, %c0_0] : memref<16x512xbf16, #tpu.memory_space<vmem>>, vector<16x512xbf16>
    %c0_1 = arith.constant 0 : index
    %c0_2 = arith.constant 0 : index
    %1 = vector.load %arg2[%c0_1, %c0_2] : memref<512x512xbf16, #tpu.memory_space<vmem>>, vector<512x512xbf16>
    %cst = arith.constant dense<0.000000e+00> : vector<16x512xf32>
    %2 = tpu.matmul %0, %1, %cst {dimension_numbers = #tpu.dot_dimension_numbers<[1], [0], [0], [1], [0, 0, 1, 1], [], []>} : vector<16x512xbf16>, vector<512x512xbf16>, vector<16x512xf32> -> vector<16x512xf32>
    %c0_3 = arith.constant 0 : index
    %c0_4 = arith.constant 0 : index
    %3 = vector.load %arg3[%c0_3, %c0_4] : memref<1x512xf32, #tpu.memory_space<vmem>>, vector<1x512xf32>
    %4 = vector.broadcast %3 : vector<1x512xf32> to vector<16x512xf32>
    %5 = arith.addf %2, %4 : vector<16x512xf32>
    %6 = arith.truncf %5 : vector<16x512xf32> to vector<16x512xbf16>
    %c0_5 = arith.constant 0 : index
    %c0_6 = arith.constant 0 : index
    %7 = vector.load %arg4[%c0_5, %c0_6] : memref<512x128xbf16, #tpu.memory_space<vmem>>, vector<512x128xbf16>
    %cst_7 = arith.constant dense<0.000000e+00> : vector<16x128xf32>
    %8 = tpu.matmul %6, %7, %cst_7 {dimension_numbers = #tpu.dot_dimension_numbers<[1], [0], [0], [1], [0, 0, 1, 1], [], []>} : vector<16x512xbf16>, vector<512x128xbf16>, vector<16x128xf32> -> vector<16x128xf32>
    %c0_8 = arith.constant 0 : index
    %c0_9 = arith.constant 0 : index
    %9 = vector.load %arg5[%c0_8, %c0_9] : memref<1x128xf32, #tpu.memory_space<vmem>>, vector<1x128xf32>
    %10 = vector.broadcast %9 : vector<1x128xf32> to vector<16x128xf32>
    %11 = arith.addf %8, %10 : vector<16x128xf32>
    %c0_10 = arith.constant 0 : index
    %c0_11 = arith.constant 0 : index
    %12 = vector.load %arg6[%c0_10, %c0_11] : memref<16x128xf32, #tpu.memory_space<vmem>>, vector<16x128xf32>
    tpu.vector_store %arg6[%c0_10, %c0_11], %11 {strides = array<i32>} : memref<16x128xf32, #tpu.memory_space<vmem>>, vector<16x128xf32>,
    return
  }
  func.func @transform_0(%arg0: i32) -> (i32, i32) {
    %c0_i32 = arith.constant 0 : i32
    %c0_i32_0 = arith.constant 0 : i32
    return %arg0, %c0_i32 : i32, i32
  }
  func.func @transform_1(%arg0: i32) -> (i32, i32) {
    %c0_i32 = arith.constant 0 : i32
    %c0_i32_0 = arith.constant 0 : i32
    %c0_i32_1 = arith.constant 0 : i32
    return %c0_i32, %c0_i32_0 : i32, i32
  }
  func.func @transform_2(%arg0: i32) -> (i32, i32) {
    %c0_i32 = arith.constant 0 : i32
    %c0_i32_0 = arith.constant 0 : i32
    %c0_i32_1 = arith.constant 0 : i32
    return %c0_i32, %c0_i32_0 : i32, i32
  }
  func.func @transform_3(%arg0: i32) -> (i32, i32) {
    %c0_i32 = arith.constant 0 : i32
    %c0_i32_0 = arith.constant 0 : i32
    %c0_i32_1 = arith.constant 0 : i32
    return %c0_i32, %c0_i32_0 : i32, i32
  }
  func.func @transform_4(%arg0: i32) -> (i32, i32) {
    %c0_i32 = arith.constant 0 : i32
    %c0_i32_0 = arith.constant 0 : i32
    %c0_i32_1 = arith.constant 0 : i32
    return %c0_i32, %c0_i32_0 : i32, i32
  }
  func.func @transform_5(%arg0: i32) -> (i32, i32) {
    %c0_i32 = arith.constant 0 : i32
    %c0_i32_0 = arith.constant 0 : i32
    return %arg0, %c0_i32 : i32, i32
  }
}

</mosaic_0001>

<bundles_post_ra>
// kernel: classifier_apply.1
= control target key start
LH: loop header
LB: loop body
LE: loop exit
PB: predicated region body
PF: predicated region fallthrough
CT: control target
= control target key end

     0   :  { %10 = vsyncpa [#allocation3], 0  ;;  %s1985_s0 = inlined_call_operand.vmem [shape: bf16[16,512], index: 0, kind: input, shape index: {}]   ;;  %s1986_s1 = inlined_call_operand.hbm [shape: bf16[512,512], index: 1, kind: input, shape index: {}]   ;;  %s1987_s2 = inlined_call_operand.vmem [shape: f32[1,512], index: 2, kind: input, shape index: {}]   ;;  %s1988_s3 = inlined_call_operand.hbm [shape: bf16[512,128], index: 3, kind: input, shape index: {}]   ;;  %s1989_s4 = inlined_call_operand.vmem [shape: f32[1,128], index: 4, kind: input, shape index: {}]   ;;  %s1990_s5 = inlined_call_operand.vmem [shape: f32[16,128], index: 5, kind: output, shape index: {}]  }
   0x1   :  { %11 = vsyncpa [#allocation5], 0  ;;  %s1901_s18 = smov [#allocation2]   ;;  %s1853_s22 = scalar_lea.hbm %s1986_s1, 16384 }
   0x2   :  { %s19_s19 = sshll.u32 %s1901_s18, 4  ;;  %p1854_p0 = scmp.ne.s32.totalorder %s1986_s1, %s1853_s22  ;;  %s20_s19 = int_to_ptr.vmem [resolvable:$true] %s19_s19 }
   0x3   :  { %p1857_p1 = scmp.lt.u32.totalorder %s1853_s22, %s1986_s1 }
   0x5   :  { %p1859_p2 = pnand %p1857_p1, %p1854_p0 }
   0x7   :  { %1862 = shalt.err (!%p1859_p2)
}
   0x8   :  { %s1863_s27 = scalar_lea.vmem %s20_s19, 16384  ;;  %p1868_p4 = scmp.lt.s32.totalorder %s20_s19, %s20_s19 }
   0x9   :  { %p1864_p3 = scmp.ne.s32.totalorder %s20_s19, %s1863_s27  ;;  %p1869_p5 = scmp.lt.s32.totalorder %s1863_s27, %s1863_s27 }
   0xb   :  { %p1870_p6 = por %p1869_p5, %p1868_p4 }
   0xd   :  { %p1871_p7 = pnand %p1870_p6, %p1864_p3 }
   0xf   :  { %1874 = shalt.err (!%p1871_p7)
}
  0x10   :  { %s1902_s28 = smov 256   ;;  %s1903_s29 = smov 16  }
  0x11   :  { %25 = dma.hbm_to_vmem [thread:$0]  %s1986_s1, 16384, %s20_s19, [#allocation3], %s1902_s28, %s1902_s28, %s1903_s29  }
  0x12   :  { %s1904_s7 = smov [#allocation4]   ;;  %s1875_s11 = scalar_lea.hbm %s1988_s3, 4096 }
  0x13   :  { %s33_s8 = sshll.u32 %s1904_s7, 4  ;;  %p1876_p8 = scmp.ne.s32.totalorder %s1988_s3, %s1875_s11  ;;  %s34_s8 = int_to_ptr.vmem [resolvable:$true] %s33_s8 }
  0x14   :  { %p1879_p9 = scmp.lt.u32.totalorder %s1875_s11, %s1988_s3 }
  0x16   :  { %p1881_p10 = pnand %p1879_p9, %p1876_p8 }
  0x18   :  { %1884 = shalt.err (!%p1881_p10)
}
  0x19   :  { %s1885_s16 = scalar_lea.vmem %s34_s8, 4096  ;;  %p1890_p12 = scmp.lt.s32.totalorder %s34_s8, %s34_s8 }
  0x1a   :  { %p1886_p11 = scmp.ne.s32.totalorder %s34_s8, %s1885_s16  ;;  %p1891_p13 = scmp.lt.s32.totalorder %s1885_s16, %s1885_s16 }
  0x1c   :  { %p1892_p0 = por %p1891_p13, %p1890_p12 }
  0x1e   :  { %p1893_p1 = pnand %p1892_p0, %p1886_p11 }
  0x20   :  { %1896 = shalt.err (!%p1893_p1)
}
  0x21   :  { %s1905_s1 = smov 64   ;;  %s1906_s17 = smov 4  }
  0x22   :  { %39 = dma.hbm_to_vmem [thread:$0]  %s1988_s3, 4096, %s34_s8, [#allocation5], %s1905_s1, %s1905_s1, %s1906_s17  }
  0x23   :  { %1897 = dma.done.wait [#allocation3], 16384  }
  0x24   :  { %1898 = vsyncadd [#allocation3], 4294950912 }
  0x25   :  { %1899 = dma.done.wait [#allocation5], 4096  }
  0x26   :  { %1900 = vsyncadd [#allocation5], 4294963200  ;;  %v1623_v0 = vld [vmem:[#allocation2 + $0x4] ss:$16 sps:$4 sm:$0xff]   ;;  %v1625_v1 = vld [vmem:[#allocation2 + $0xc] ss:$16 sps:$4 sm:$0xff]  }
  0x27   :  { %863 = vmatprep.subr.bf16.mxu0 %v1623_v0  ;;  %v1627_v2 = vld [vmem:[#allocation2] ss:$16 sps:$4 sm:$0xff]   ;;  %v1628_v3 = vld [vmem:[#allocation2 + $0x8] ss:$16 sps:$4 sm:$0xff]   ;;  %949 = vmatprep.subr.bf16.mxu1 %v1625_v1  ;;  %v1629_v4 = vld [vmem:[#allocation2 + $0x24] ss:$16 sps:$4 sm:$0xff]  }
  0x28   :  { %864 = vmatpush1.bf16.msra.mxu0 %v1627_v2  ;;  %950 = vmatpush1.bf16.msra.mxu1 %v1628_v3  ;;  %v1631_v5 = vld [vmem:[#allocation2 + $0x2c] ss:$16 sps:$4 sm:$0xff]   ;;  %v1633_v6 = vld [vmem:[#allocation2 + $0x20] ss:$16 sps:$4 sm:$0xff]   ;;  %v1634_v7 = vld [vmem:[#allocation2 + $0x28] ss:$16 sps:$4 sm:$0xff]  }
  0x29   :  { %865 = vmatprep.subr.bf16.mxu0 %v1629_v4  ;;  %951 = vmatprep.subr.bf16.mxu1 %v1631_v5  ;;  %v1635_v8 = vld [vmem:[#allocation2 + $0x44] ss:$16 sps:$4 sm:$0xff]   ;;  %v1637_v9 = vld [vmem:[#allocation2 + $0x4c] ss:$16 sps:$4 sm:$0xff]   ;;  %v1639_v10 = vld [vmem:[#allocation2 + $0x40] ss:$16 sps:$4 sm:$0xff]  }
  0x2a   :  { %v1640_v11 = vld [vmem:[#allocation2 + $0x48] ss:$16 sps:$4 sm:$0xff]   ;;  %v1641_v12 = vld [vmem:[#allocation2 + $0x64] ss:$16 sps:$4 sm:$0xff]   ;;  %v1643_v13 = vld [vmem:[#allocation2 + $0x6c] ss:$16 sps:$4 sm:$0xff]  }
  0x2b   :  { %v1645_v14 = vld [vmem:[#allocation2 + $0x60] ss:$16 sps:$4 sm:$0xff]   ;;  %v1646_v15 = vld [vmem:[#allocation2 + $0x68] ss:$16 sps:$4 sm:$0xff]   ;;  %v1647_v16 = vld [vmem:[#allocation2 + $0x84] ss:$16 sps:$4 sm:$0xff]  }
  0x2c   :  { %866 = vmatpush1.bf16.msra.mxu0 %v1633_v6  ;;  %952 = vmatpush1.bf16.msra.mxu1 %v1634_v7  ;;  %v1649_v17 = vld [vmem:[#allocation2 + $0x8c] ss:$16 sps:$4 sm:$0xff]   ;;  %v1651_v18 = vld [vmem:[#allocation2 + $0x80] ss:$16 sps:$4 sm:$0xff]   ;;  %v1652_v19 = vld [vmem:[#allocation2 + $0x88] ss:$16 sps:$4 sm:$0xff]  }
  0x2d   :  { %867 = vmatprep.subr.bf16.mxu0 %v1635_v8  ;;  %953 = vmatprep.subr.bf16.mxu1 %v1637_v9  ;;  %v1653_v20 = vld [vmem:[#allocation2 + $0xa4] ss:$16 sps:$4 sm:$0xff]   ;;  %v1655_v21 = vld [vmem:[#allocation2 + $0xac] ss:$16 sps:$4 sm:$0xff]   ;;  %v1657_v22 = vld [vmem:[#allocation2 + $0xa0] ss:$16 sps:$4 sm:$0xff]  }
  0x2e   :  { %v1658_v23 = vld [vmem:[#allocation2 + $0xa8] ss:$16 sps:$4 sm:$0xff]   ;;  %v1659_v24 = vld [vmem:[#allocation2 + $0xc4] ss:$16 sps:$4 sm:$0xff]   ;;  %v1661_v25 = vld [vmem:[#allocation2 + $0xcc] ss:$16 sps:$4 sm:$0xff]  }
  0x2f   :  { %v1663_v26 = vld [vmem:[#allocation2 + $0xc0] ss:$16 sps:$4 sm:$0xff]   ;;  %v1664_v27 = vld [vmem:[#allocation2 + $0xc8] ss:$16 sps:$4 sm:$0xff]   ;;  %v1665_v28 = vld [vmem:[#allocation2 + $0xe4] ss:$16 sps:$4 sm:$0xff]  }
  0x30   :  { %868 = vmatpush1.bf16.msra.mxu0 %v1639_v10  ;;  %954 = vmatpush1.bf16.msra.mxu1 %v1640_v11  ;;  %v1667_v29 = vld [vmem:[#allocation2 + $0xec] ss:$16 sps:$4 sm:$0xff]   ;;  %v1669_v30 = vld [vmem:[#allocation2 + $0xe0] ss:$16 sps:$4 sm:$0xff]   ;;  %v1670_v31 = vld [vmem:[#allocation2 + $0xe8] ss:$16 sps:$4 sm:$0xff]  }
  0x31   :  { %869 = vmatprep.subr.bf16.mxu0 %v1641_v12  ;;  %955 = vmatprep.subr.bf16.mxu1 %v1643_v13  ;;  %v1671_v32 = vld [vmem:[#allocation2 + $0x104] ss:$16 sps:$4 sm:$0xff]   ;;  %v1673_v33 = vld [vmem:[#allocation2 + $0x10c] ss:$16 sps:$4 sm:$0xff]   ;;  %v1675_v34 = vld [vmem:[#allocation2 + $0x100] ss:$16 sps:$4 sm:$0xff]  }
  0x32   :  { %v1676_v35 = vld [vmem:[#allocation2 + $0x108] ss:$16 sps:$4 sm:$0xff]   ;;  %v1677_v36 = vld [vmem:[#allocation2 + $0x124] ss:$16 sps:$4 sm:$0xff]   ;;  %v1679_v37 = vld [vmem:[#allocation2 + $0x12c] ss:$16 sps:$4 sm:$0xff]  }
  0x33   :  { %v1681_v38 = vld [vmem:[#allocation2 + $0x120] ss:$16 sps:$4 sm:$0xff]   ;;  %v1682_v39 = vld [vmem:[#allocation2 + $0x128] ss:$16 sps:$4 sm:$0xff]   ;;  %v1683_v40 = vld [vmem:[#allocation2 + $0x144] ss:$16 sps:$4 sm:$0xff]  }
  0x34   :  { %870 = vmatpush1.bf16.msra.mxu0 %v1645_v14  ;;  %956 = vmatpush1.bf16.msra.mxu1 %v1646_v15  ;;  %v1685_v41 = vld [vmem:[#allocation2 + $0x14c] ss:$16 sps:$4 sm:$0xff]   ;;  %v1687_v42 = vld [vmem:[#allocation2 + $0x140] ss:$16 sps:$4 sm:$0xff]   ;;  %v1688_v43 = vld [vmem:[#allocation2 + $0x148] ss:$16 sps:$4 sm:$0xff]  }
  0x35   :  { %871 = vmatprep.subr.bf16.mxu0 %v1647_v16  ;;  %957 = vmatprep.subr.bf16.mxu1 %v1649_v17  ;;  %v1689_v44 = vld [vmem:[#allocation2 + $0x164] ss:$16 sps:$4 sm:$0xff]   ;;  %v1691_v45 = vld [vmem:[#allocation2 + $0x16c] ss:$16 sps:$4 sm:$0xff]   ;;  %v1693_v46 = vld [vmem:[#allocation2 + $0x160] ss:$16 sps:$4 sm:$0xff]  }
  0x36   :  { %v1694_v47 = vld [vmem:[#allocation2 + $0x168] ss:$16 sps:$4 sm:$0xff]   ;;  %v1721_v48 = vld [vmem:[%s1985_s0 + $0x4] ss:$16 sps:$4 sm:$0xff]   ;;  %v1697_v50 = vld [vmem:[#allocation2 + $0x18c] ss:$16 sps:$4 sm:$0xff]  }
  0x37   :  { %v1695_v49 = vld [vmem:[#allocation2 + $0x184] ss:$16 sps:$4 sm:$0xff]   ;;  %895 = vmatprep.mubr.bf16.mxu0 %v1721_v48  ;;  %981 = vmatprep.mubr.bf16.mxu1 %v1721_v48  ;;  %v1699_v51 = vld [vmem:[#allocation2 + $0x180] ss:$16 sps:$4 sm:$0xff]   ;;  %v1700_v52 = vld [vmem:[#allocation2 + $0x188] ss:$16 sps:$4 sm:$0xff]  }
  0x38   :  { %872 = vmatpush1.bf16.msra.mxu0 %v1651_v18  ;;  %958 = vmatpush1.bf16.msra.mxu1 %v1652_v19  ;;  %v1701_v53 = vld [vmem:[#allocation2 + $0x1a4] ss:$16 sps:$4 sm:$0xff]   ;;  %v1703_v54 = vld [vmem:[#allocation2 + $0x1ac] ss:$16 sps:$4 sm:$0xff]   ;;  %v1705_v55 = vld [vmem:[#allocation2 + $0x1a0] ss:$16 sps:$4 sm:$0xff]  }
  0x39   :  { %873 = vmatprep.subr.bf16.mxu0 %v1653_v20  ;;  %959 = vmatprep.subr.bf16.mxu1 %v1655_v21  ;;  %v1706_v56 = vld [vmem:[#allocation2 + $0x1a8] ss:$16 sps:$4 sm:$0xff]   ;;  %v1707_v57 = vld [vmem:[#allocation2 + $0x1c4] ss:$16 sps:$4 sm:$0xff]   ;;  %v1709_v58 = vld [vmem:[#allocation2 + $0x1cc] ss:$16 sps:$4 sm:$0xff]  }
  0x3a   :  { %v1711_v59 = vld [vmem:[#allocation2 + $0x1c0] ss:$16 sps:$4 sm:$0xff]   ;;  %v1712_v60 = vld [vmem:[#allocation2 + $0x1c8] ss:$16 sps:$4 sm:$0xff]   ;;  %v1713_v61 = vld [vmem:[#allocation2 + $0x1e4] ss:$16 sps:$4 sm:$0xff]  }
  0x3b   :  { %v1715_v62 = vld [vmem:[#allocation2 + $0x1ec] ss:$16 sps:$4 sm:$0xff]   ;;  %v1717_v63 = vld [vmem:[#allocation2 + $0x1e0] ss:$16 sps:$4 sm:$0xff]   ;;  %v1718_v0 = vld [vmem:[#allocation2 + $0x1e8] ss:$16 sps:$4 sm:$0xff]  }
  0x3c   :  { %874 = vmatpush1.bf16.msra.mxu0 %v1657_v22  ;;  %960 = vmatpush1.bf16.msra.mxu1 %v1658_v23  ;;  %v1724_v1 = vld [vmem:[#allocation2 + $0x204] ss:$16 sps:$4 sm:$0xff]   ;;  %v1727_v2 = vld [vmem:[#allocation2 + $0x20c] ss:$16 sps:$4 sm:$0xff]   ;;  %v1719_v3 = vld [vmem:[%s1985_s0] ss:$16 sps:$4 sm:$0xff]  }
  0x3d   :  { %875 = vmatprep.subr.bf16.mxu0 %v1659_v24  ;;  %961 = vmatprep.subr.bf16.mxu1 %v1661_v25  ;;  %v1722_v4 = vld [vmem:[#allocation2 + $0x200] ss:$16 sps:$4 sm:$0xff]   ;;  %v1725_v5 = vld [vmem:[#allocation2 + $0x208] ss:$16 sps:$4 sm:$0xff]   ;;  %v1730_v6 = vld [vmem:[#allocation2 + $0x224] ss:$16 sps:$4 sm:$0xff]  }
  0x3e   :  { %v1733_v7 = vld [vmem:[#allocation2 + $0x22c] ss:$16 sps:$4 sm:$0xff]   ;;  %v1728_v8 = vld [vmem:[#allocation2 + $0x220] ss:$16 sps:$4 sm:$0xff]   ;;  %v1731_v9 = vld [vmem:[#allocation2 + $0x228] ss:$16 sps:$4 sm:$0xff]  }
  0x3f   :  { %v1736_v10 = vld [vmem:[#allocation2 + $0x244] ss:$16 sps:$4 sm:$0xff]   ;;  %v1739_v11 = vld [vmem:[#allocation2 + $0x24c] ss:$16 sps:$4 sm:$0xff]   ;;  %v1734_v12 = vld [vmem:[#allocation2 + $0x240] ss:$16 sps:$4 sm:$0xff]  }
  0x40   :  { %876 = vmatpush1.bf16.msra.mxu0 %v1663_v26  ;;  %962 = vmatpush1.bf16.msra.mxu1 %v1664_v27  ;;  %v1737_v13 = vld [vmem:[#allocation2 + $0x248] ss:$16 sps:$4 sm:$0xff]   ;;  %v1742_v14 = vld [vmem:[#allocation2 + $0x264] ss:$16 sps:$4 sm:$0xff]   ;;  %v1745_v15 = vld [vmem:[#allocation2 + $0x26c] ss:$16 sps:$4 sm:$0xff]  }
  0x41   :  { %877 = vmatprep.subr.bf16.mxu0 %v1665_v28  ;;  %963 = vmatprep.subr.bf16.mxu1 %v1667_v29  ;;  %v1740_v16 = vld [vmem:[#allocation2 + $0x260] ss:$16 sps:$4 sm:$0xff]   ;;  %v1743_v17 = vld [vmem:[#allocation2 + $0x268] ss:$16 sps:$4 sm:$0xff]   ;;  %v1748_v18 = vld [vmem:[#allocation2 + $0x284] ss:$16 sps:$4 sm:$0xff]  }
  0x42   :  { %v1751_v19 = vld [vmem:[#allocation2 + $0x28c] ss:$16 sps:$4 sm:$0xff]   ;;  %v1746_v20 = vld [vmem:[#allocation2 + $0x280] ss:$16 sps:$4 sm:$0xff]   ;;  %v1749_v21 = vld [vmem:[#allocation2 + $0x288] ss:$16 sps:$4 sm:$0xff]  }
  0x43   :  { %v1754_v22 = vld [vmem:[#allocation2 + $0x2a4] ss:$16 sps:$4 sm:$0xff]   ;;  %v1757_v23 = vld [vmem:[#allocation2 + $0x2ac] ss:$16 sps:$4 sm:$0xff]   ;;  %v1752_v24 = vld [vmem:[#allocation2 + $0x2a0] ss:$16 sps:$4 sm:$0xff]  }
  0x44   :  { %878 = vmatpush1.bf16.msra.mxu0 %v1669_v30  ;;  %964 = vmatpush1.bf16.msra.mxu1 %v1670_v31  ;;  %v1755_v25 = vld [vmem:[#allocation2 + $0x2a8] ss:$16 sps:$4 sm:$0xff]   ;;  %v1760_v26 = vld [vmem:[#allocation2 + $0x2c4] ss:$16 sps:$4 sm:$0xff]   ;;  %v1763_v27 = vld [vmem:[#allocation2 + $0x2cc] ss:$16 sps:$4 sm:$0xff]  }
  0x45   :  { %879 = vmatprep.subr.bf16.mxu0 %v1671_v32  ;;  %965 = vmatprep.subr.bf16.mxu1 %v1673_v33  ;;  %v1758_v28 = vld [vmem:[#allocation2 + $0x2c0] ss:$16 sps:$4 sm:$0xff]   ;;  %v1761_v29 = vld [vmem:[#allocation2 + $0x2c8] ss:$16 sps:$4 sm:$0xff]   ;;  %v1820_v30 = vld [vmem:[%s1985_s0 + $0xc] ss:$16 sps:$4 sm:$0xff]  }
  0x46   :  { %v1766_v31 = vld [vmem:[#allocation2 + $0x2e4] ss:$16 sps:$4 sm:$0xff]   ;;  %v1769_v32 = vld [vmem:[#allocation2 + $0x2ec] ss:$16 sps:$4 sm:$0xff]   ;;  %v1764_v33 = vld [vmem:[#allocation2 + $0x2e0] ss:$16 sps:$4 sm:$0xff]  }
  0x47   :  { %v1793_v48 = vld [vmem:[#allocation2 + $0x36c] ss:$16 sps:$4 sm:$0xff]  }
  0x48   :  { %880 = vmatpush1.bf16.msra.mxu0 %v1675_v34  ;;  %966 = vmatpush1.bf16.msra.mxu1 %v1676_v35  ;;  %v1767_v34 = vld [vmem:[#allocation2 + $0x2e8] ss:$16 sps:$4 sm:$0xff]   ;;  %v1772_v35 = vld [vmem:[#allocation2 + $0x304] ss:$16 sps:$4 sm:$0xff]  }
  0x49   :  { %881 = vmatprep.subr.bf16.mxu0 %v1677_v36  ;;  %967 = vmatprep.subr.bf16.mxu1 %v1679_v37  ;;  %v1775_v36 = vld [vmem:[#allocation2 + $0x30c] ss:$16 sps:$4 sm:$0xff]   ;;  %v1770_v37 = vld [vmem:[#allocation2 + $0x300] ss:$16 sps:$4 sm:$0xff]  }
  0x4c   :  { %882 = vmatpush1.bf16.msra.mxu0 %v1681_v38  ;;  %968 = vmatpush1.bf16.msra.mxu1 %v1682_v39  ;;  %v1773_v38 = vld [vmem:[#allocation2 + $0x308] ss:$16 sps:$4 sm:$0xff]   ;;  %v1778_v39 = vld [vmem:[#allocation2 + $0x324] ss:$16 sps:$4 sm:$0xff]  }
  0x4d   :  { %883 = vmatprep.subr.bf16.mxu0 %v1683_v40  ;;  %969 = vmatprep.subr.bf16.mxu1 %v1685_v41  ;;  %v1781_v40 = vld [vmem:[#allocation2 + $0x32c] ss:$16 sps:$4 sm:$0xff]   ;;  %v1776_v41 = vld [vmem:[#allocation2 + $0x320] ss:$16 sps:$4 sm:$0xff]  }
  0x50   :  { %884 = vmatpush1.bf16.msra.mxu0 %v1687_v42  ;;  %970 = vmatpush1.bf16.msra.mxu1 %v1688_v43  ;;  %v1779_v42 = vld [vmem:[#allocation2 + $0x328] ss:$16 sps:$4 sm:$0xff]   ;;  %v1784_v43 = vld [vmem:[#allocation2 + $0x344] ss:$16 sps:$4 sm:$0xff]  }
  0x51   :  { %885 = vmatprep.subr.bf16.mxu0 %v1689_v44  ;;  %971 = vmatprep.subr.bf16.mxu1 %v1691_v45  ;;  %v1787_v44 = vld [vmem:[#allocation2 + $0x34c] ss:$16 sps:$4 sm:$0xff]   ;;  %v1782_v45 = vld [vmem:[#allocation2 + $0x340] ss:$16 sps:$4 sm:$0xff]  }
  0x54   :  { %886 = vmatpush1.bf16.msra.mxu0 %v1693_v46  ;;  %972 = vmatpush1.bf16.msra.mxu1 %v1694_v47  ;;  %v1785_v46 = vld [vmem:[#allocation2 + $0x348] ss:$16 sps:$4 sm:$0xff]   ;;  %v1790_v47 = vld [vmem:[#allocation2 + $0x364] ss:$16 sps:$4 sm:$0xff]  }
  0x55   :  { %887 = vmatprep.subr.bf16.mxu0 %v1695_v49  ;;  %973 = vmatprep.subr.bf16.mxu1 %v1697_v50  ;;  %v1788_v49 = vld [vmem:[#allocation2 + $0x360] ss:$16 sps:$4 sm:$0xff]   ;;  %v1791_v50 = vld [vmem:[#allocation2 + $0x368] ss:$16 sps:$4 sm:$0xff]  }
  0x58   :  { %888 = vmatpush1.bf16.msra.mxu0 %v1699_v51  ;;  %974 = vmatpush1.bf16.msra.mxu1 %v1700_v52  ;;  %v1796_v51 = vld [vmem:[#allocation2 + $0x384] ss:$16 sps:$4 sm:$0xff]   ;;  %v1799_v52 = vld [vmem:[#allocation2 + $0x38c] ss:$16 sps:$4 sm:$0xff]  }
  0x59   :  { %889 = vmatprep.subr.bf16.mxu0 %v1701_v53  ;;  %975 = vmatprep.subr.bf16.mxu1 %v1703_v54  ;;  %v1794_v53 = vld [vmem:[#allocation2 + $0x380] ss:$16 sps:$4 sm:$0xff]   ;;  %v1797_v54 = vld [vmem:[#allocation2 + $0x388] ss:$16 sps:$4 sm:$0xff]  }
  0x5c   :  { %890 = vmatpush1.bf16.msra.mxu0 %v1705_v55  ;;  %976 = vmatpush1.bf16.msra.mxu1 %v1706_v56  ;;  %v1802_v55 = vld [vmem:[#allocation2 + $0x3a4] ss:$16 sps:$4 sm:$0xff]   ;;  %v1805_v56 = vld [vmem:[#allocation2 + $0x3ac] ss:$16 sps:$4 sm:$0xff]  }
  0x5d   :  { %891 = vmatprep.subr.bf16.mxu0 %v1707_v57  ;;  %977 = vmatprep.subr.bf16.mxu1 %v1709_v58  ;;  %v1800_v57 = vld [vmem:[#allocation2 + $0x3a0] ss:$16 sps:$4 sm:$0xff]   ;;  %v1803_v58 = vld [vmem:[#allocation2 + $0x3a8] ss:$16 sps:$4 sm:$0xff]  }
  0x60   :  { %892 = vmatpush1.bf16.msra.mxu0 %v1711_v59  ;;  %978 = vmatpush1.bf16.msra.mxu1 %v1712_v60  ;;  %v1808_v59 = vld [vmem:[#allocation2 + $0x3c4] ss:$16 sps:$4 sm:$0xff]   ;;  %v1811_v60 = vld [vmem:[#allocation2 + $0x3cc] ss:$16 sps:$4 sm:$0xff]  }
  0x61   :  { %893 = vmatprep.subr.bf16.mxu0 %v1713_v61  ;;  %979 = vmatprep.subr.bf16.mxu1 %v1715_v62  ;;  %v1806_v61 = vld [vmem:[#allocation2 + $0x3c0] ss:$16 sps:$4 sm:$0xff]   ;;  %v1809_v62 = vld [vmem:[#allocation2 + $0x3c8] ss:$16 sps:$4 sm:$0xff]  }
  0x64   :  { %894 = vmatpush1.bf16.msra.mxu0 %v1717_v63  ;;  %980 = vmatpush1.bf16.msra.mxu1 %v1718_v0  ;;  %v1814_v63 = vld [vmem:[#allocation2 + $0x3e4] ss:$16 sps:$4 sm:$0xff]   ;;  %v1817_v0 = vld [vmem:[#allocation2 + $0x3ec] ss:$16 sps:$4 sm:$0xff]  }
  0x65   :  { %906 = vmatprep.subr.bf16.mxu0 %v1724_v1  ;;  %992 = vmatprep.subr.bf16.mxu1 %v1727_v2  ;;  %v1812_v1 = vld [vmem:[#allocation2 + $0x3e0] ss:$16 sps:$4 sm:$0xff]   ;;  %v1815_v2 = vld [vmem:[#allocation2 + $0x3e8] ss:$16 sps:$4 sm:$0xff]  }
  0x67   :  { %896 = vmatmul.mubr.bf16.vlgmr.msra.gmra.mrb[0].mxu0 %v1719_v3  ;;  %982 = vmatmul.mubr.bf16.vlgmr.msra.gmra.mrb[0].mxu1 %v1719_v3  ;;  %v1821_v3 = vld [vmem:[#allocation4 + $0x40] sm:$0xff]  }
  0x68   :  { %907 = vmatpush1.bf16.msra.mxu0 %v1722_v4  ;;  %993 = vmatpush1.bf16.msra.mxu1 %v1725_v5  ;;  %v1822_v4 = vld [vmem:[#allocation4 + $0xc0] sm:$0xff]   ;;  %v1818_v5 = vld [vmem:[%s1985_s0 + $0x8] ss:$16 sps:$4 sm:$0xff]  }
  0x69   :  { %908 = vmatprep.subr.bf16.mxu0 %v1730_v6  ;;  %994 = vmatprep.subr.bf16.mxu1 %v1733_v7  ;;  %v1823_v6 = vld [vmem:[#allocation4] sm:$0xff]  }
  0x6a   :  { %938 = vmatprep.mubr.bf16.mxu0 %v1820_v30  ;;  %1024 = vmatprep.mubr.bf16.mxu1 %v1820_v30  ;;  %v1824_v7 = vld [vmem:[#allocation4 + $0x80] sm:$0xff]   ;;  %v1847_v30 = vld [vmem:[#allocation4 + $0x30] sm:$0xff]  }
  0x6c   :  { %909 = vmatpush1.bf16.msra.mxu0 %v1728_v8  ;;  %995 = vmatpush1.bf16.msra.mxu1 %v1731_v9  ;;  %v1825_v8 = vld [vmem:[#allocation4 + $0x48] sm:$0xff]  }
  0x6d   :  { %910 = vmatprep.subr.bf16.mxu0 %v1736_v10  ;;  %996 = vmatprep.subr.bf16.mxu1 %v1739_v11  ;;  %v1826_v9 = vld [vmem:[#allocation4 + $0xc8] sm:$0xff]  }
  0x6e   :  { %v1827_v10 = vld [vmem:[#allocation4 + $0x8] sm:$0xff]  }
  0x6f   :  { %v1828_v11 = vld [vmem:[#allocation4 + $0x88] sm:$0xff]  }
  0x70   :  { %911 = vmatpush1.bf16.msra.mxu0 %v1734_v12  ;;  %997 = vmatpush1.bf16.msra.mxu1 %v1737_v13  ;;  %v1829_v12 = vld [vmem:[#allocation4 + $0x50] sm:$0xff]  }
  0x71   :  { %912 = vmatprep.subr.bf16.mxu0 %v1742_v14  ;;  %998 = vmatprep.subr.bf16.mxu1 %v1745_v15  ;;  %v1830_v13 = vld [vmem:[#allocation4 + $0xd0] sm:$0xff]  }
  0x72   :  { %v1831_v14 = vld [vmem:[#allocation4 + $0x10] sm:$0xff]  }
  0x73   :  { %v1832_v15 = vld [vmem:[#allocation4 + $0x90] sm:$0xff]  }
  0x74   :  { %913 = vmatpush1.bf16.msra.mxu0 %v1740_v16  ;;  %999 = vmatpush1.bf16.msra.mxu1 %v1743_v17  ;;  %v1833_v16 = vld [vmem:[#allocation4 + $0x58] sm:$0xff]  }
  0x75   :  { %914 = vmatprep.subr.bf16.mxu0 %v1748_v18  ;;  %1000 = vmatprep.subr.bf16.mxu1 %v1751_v19  ;;  %v1834_v17 = vld [vmem:[#allocation4 + $0xd8] sm:$0xff]  }
  0x76   :  { %v1835_v18 = vld [vmem:[#allocation4 + $0x18] sm:$0xff]  }
  0x77   :  { %v1836_v19 = vld [vmem:[#allocation4 + $0x98] sm:$0xff]  }
  0x78   :  { %915 = vmatpush1.bf16.msra.mxu0 %v1746_v20  ;;  %1001 = vmatpush1.bf16.msra.mxu1 %v1749_v21  ;;  %v1837_v20 = vld [vmem:[#allocation4 + $0x60] sm:$0xff]  }
  0x79   :  { %916 = vmatprep.subr.bf16.mxu0 %v1754_v22  ;;  %1002 = vmatprep.subr.bf16.mxu1 %v1757_v23  ;;  %v1838_v21 = vld [vmem:[#allocation4 + $0xe0] sm:$0xff]  }
  0x7a   :  { %v1839_v22 = vld [vmem:[#allocation4 + $0x20] sm:$0xff]  }
  0x7b   :  { %v1840_v23 = vld [vmem:[#allocation4 + $0xa0] sm:$0xff]  }
  0x7c   :  { %917 = vmatpush1.bf16.msra.mxu0 %v1752_v24  ;;  %1003 = vmatpush1.bf16.msra.mxu1 %v1755_v25  ;;  %v1841_v24 = vld [vmem:[#allocation4 + $0x68] sm:$0xff]  }
  0x7d   :  { %918 = vmatprep.subr.bf16.mxu0 %v1760_v26  ;;  %1004 = vmatprep.subr.bf16.mxu1 %v1763_v27  ;;  %v1842_v25 = vld [vmem:[#allocation4 + $0xe8] sm:$0xff]  }
  0x7e   :  { %v1843_v26 = vld [vmem:[#allocation4 + $0x28] sm:$0xff]  }
  0x7f   :  { %v1844_v27 = vld [vmem:[#allocation4 + $0xa8] sm:$0xff]  }
  0x80   :  { %919 = vmatpush1.bf16.msra.mxu0 %v1758_v28  ;;  %1005 = vmatpush1.bf16.msra.mxu1 %v1761_v29  ;;  %v1845_v28 = vld [vmem:[#allocation4 + $0x70] sm:$0xff]  }
  0x81   :  { %920 = vmatprep.subr.bf16.mxu0 %v1766_v31  ;;  %1006 = vmatprep.subr.bf16.mxu1 %v1769_v32  ;;  %v1846_v29 = vld [vmem:[#allocation4 + $0xf0] sm:$0xff]   ;;  %v1849_v32 = vld [vmem:[#allocation4 + $0x78] sm:$0xff]  }
  0x82   :  { %v1848_v31 = vld [vmem:[#allocation4 + $0xb0] sm:$0xff]  }
  0x84   :  { %921 = vmatpush1.bf16.msra.mxu0 %v1764_v33  ;;  %1007 = vmatpush1.bf16.msra.mxu1 %v1767_v34  ;;  %v1850_v33 = vld [vmem:[#allocation4 + $0xf8] sm:$0xff]  }
  0x85   :  { %922 = vmatprep.subr.bf16.mxu0 %v1772_v35  ;;  %1008 = vmatprep.subr.bf16.mxu1 %v1775_v36  ;;  %v1851_v34 = vld [vmem:[#allocation4 + $0x38] sm:$0xff]   ;;  %v183_v36 = vlaneseq }
  0x86   :  { %v1852_v35 = vld [vmem:[#allocation4 + $0xb8] sm:$0xff]  }
  0x88   :  { %923 = vmatpush1.bf16.msra.mxu0 %v1770_v37  ;;  %1009 = vmatpush1.bf16.msra.mxu1 %v1773_v38  ;;  %v184_v37 = vshrl.u32 %v183_v36, 7 }
  0x89   :  { %924 = vmatprep.subr.bf16.mxu0 %v1778_v39  ;;  %1010 = vmatprep.subr.bf16.mxu1 %v1781_v40  ;;  %v181_v40 = vld [vmem:[%s1987_s2] sm:$0xf] }
  0x8a   :  { %v185_v38 = vsub.s32 0, %v184_v37  ;;  %v193_v39 = vsub.s32 2, %v184_v37 }
  0x8c   :  { %925 = vmatpush1.bf16.msra.mxu0 %v1776_v41  ;;  %1011 = vmatpush1.bf16.msra.mxu1 %v1779_v42  ;;  %v189_v41 = vsub.s32 1, %v184_v37  ;;  %v197_v42 = vsub.s32 3, %v184_v37 }
  0x8d   :  { %926 = vmatprep.subr.bf16.mxu0 %v1784_v43  ;;  %1012 = vmatprep.subr.bf16.mxu1 %v1787_v44  ;;  %v186_v43 = vrot.slane %v181_v40, %v185_v38  ;;  %v194_v44 = vrot.slane %v181_v40, %v193_v39 }
  0x90   :  { %927 = vmatpush1.bf16.msra.mxu0 %v1782_v45  ;;  %1013 = vmatpush1.bf16.msra.mxu1 %v1785_v46 }
  0x91   :  { %928 = vmatprep.subr.bf16.mxu0 %v1790_v47  ;;  %1014 = vmatprep.subr.bf16.mxu1 %v1793_v48  ;;  %v190_v47 = vrot.slane %v181_v40, %v189_v41  ;;  %v198_v48 = vrot.slane %v181_v40, %v197_v42 }
  0x94   :  { %929 = vmatpush1.bf16.msra.mxu0 %v1788_v49  ;;  %1015 = vmatpush1.bf16.msra.mxu1 %v1791_v50 }
  0x95   :  { %930 = vmatprep.subr.bf16.mxu0 %v1796_v51  ;;  %1016 = vmatprep.subr.bf16.mxu1 %v1799_v52 }
  0x98   :  { %931 = vmatpush1.bf16.msra.mxu0 %v1794_v53  ;;  %1017 = vmatpush1.bf16.msra.mxu1 %v1797_v54 }
  0x99   :  { %932 = vmatprep.subr.bf16.mxu0 %v1802_v55  ;;  %1018 = vmatprep.subr.bf16.mxu1 %v1805_v56 }
  0x9c   :  { %933 = vmatpush1.bf16.msra.mxu0 %v1800_v57  ;;  %1019 = vmatpush1.bf16.msra.mxu1 %v1803_v58 }
  0x9d   :  { %934 = vmatprep.subr.bf16.mxu0 %v1808_v59  ;;  %1020 = vmatprep.subr.bf16.mxu1 %v1811_v60 }
  0xa0   :  { %935 = vmatpush1.bf16.msra.mxu0 %v1806_v61  ;;  %1021 = vmatpush1.bf16.msra.mxu1 %v1809_v62 }
  0xa1   :  { %936 = vmatprep.subr.bf16.mxu0 %v1814_v63  ;;  %1022 = vmatprep.subr.bf16.mxu1 %v1817_v0 }
  0xa4   :  { %937 = vmatpush1.bf16.msra.mxu0 %v1812_v1  ;;  %1023 = vmatpush1.bf16.msra.mxu1 %v1815_v2 }
  0xa5   :  { %1557 = vmatprep.subr.bf16.mxu0 %v1821_v3  ;;  %1579 = vmatprep.subr.bf16.mxu1 %v1822_v4 }
  0xa7   :  { %939 = vmatmul.mubr.bf16.vlgmr.msra.gmra.mrb[0].mxu0 %v1818_v5  ;;  %1025 = vmatmul.mubr.bf16.vlgmr.msra.gmra.mrb[0].mxu1 %v1818_v5  ;;  %v1524_v5 = vld [vmem:[%s1989_s4] ss:$0 sm:$0xff] }
  0xa8   :  { %1558 = vmatpush3.bf16.msra.mxu0 %v1823_v6  ;;  %1580 = vmatpush3.bf16.msra.mxu1 %v1824_v7 }
  0xa9   :  { %1559 = vmatprep.subr.bf16.mxu0 %v1825_v8  ;;  %1581 = vmatprep.subr.bf16.mxu1 %v1826_v9 }
  0xac   :  { %1560 = vmatpush3.bf16.msra.mxu0 %v1827_v10  ;;  %1582 = vmatpush3.bf16.msra.mxu1 %v1828_v11 }
  0xad   :  { %1561 = vmatprep.subr.bf16.mxu0 %v1829_v12  ;;  %1583 = vmatprep.subr.bf16.mxu1 %v1830_v13 }
  0xb0   :  { %1562 = vmatpush3.bf16.msra.mxu0 %v1831_v14  ;;  %1584 = vmatpush3.bf16.msra.mxu1 %v1832_v15 }
  0xb1   :  { %1563 = vmatprep.subr.bf16.mxu0 %v1833_v16  ;;  %1585 = vmatprep.subr.bf16.mxu1 %v1834_v17 }
  0xb4   :  { %1564 = vmatpush3.bf16.msra.mxu0 %v1835_v18  ;;  %1586 = vmatpush3.bf16.msra.mxu1 %v1836_v19 }
  0xb5   :  { %1565 = vmatprep.subr.bf16.mxu0 %v1837_v20  ;;  %1587 = vmatprep.subr.bf16.mxu1 %v1838_v21 }
  0xb8   :  { %1566 = vmatpush3.bf16.msra.mxu0 %v1839_v22  ;;  %1588 = vmatpush3.bf16.msra.mxu1 %v1840_v23 }
  0xb9   :  { %1567 = vmatprep.subr.bf16.mxu0 %v1841_v24  ;;  %1589 = vmatprep.subr.bf16.mxu1 %v1842_v25 }
  0xbc   :  { %1568 = vmatpush3.bf16.msra.mxu0 %v1843_v26  ;;  %1590 = vmatpush3.bf16.msra.mxu1 %v1844_v27 }
  0xbd   :  { %1569 = vmatprep.subr.bf16.mxu0 %v1845_v28  ;;  %1591 = vmatprep.subr.bf16.mxu1 %v1846_v29 }
  0xc0   :  { %1570 = vmatpush3.bf16.msra.mxu0 %v1847_v30  ;;  %1592 = vmatpush3.bf16.msra.mxu1 %v1848_v31 }
  0xc1   :  { %1571 = vmatprep.subr.bf16.mxu0 %v1849_v32  ;;  %1593 = vmatprep.subr.bf16.mxu1 %v1850_v33 }
  0xc4   :  { %1572 = vmatpush3.bf16.msra.mxu0 %v1851_v34  ;;  %1594 = vmatpush3.bf16.msra.mxu1 %v1852_v35 }
 0x17a   :  { %v940_v45 = vpop.f32.mrb[0].mxu0  ;;  %v1026_v46 = vpop.f32.mrb[0].mxu1 }
 0x17b   :  { %v942_v49 = vpop.f32.mrb[1].mxu0  ;;  %v1028_v50 = vpop.f32.mrb[1].mxu1  ;;  %v1601_v53 = vadd.f32 %v940_v45, %v186_v43  ;;  %v1605_v54 = vadd.f32 %v1026_v46, %v194_v44 }
 0x17c   :  { %v944_v51 = vpop.f32.mrb[2].mxu0  ;;  %v1030_v52 = vpop.f32.mrb[2].mxu1  ;;  %v1602_v59 = vadd.f32 %v942_v49, %v190_v47  ;;  %v1606_v60 = vadd.f32 %v1028_v50, %v198_v48 }
 0x17d   :  { %v1603_v55 = vadd.f32 %v944_v51, %v186_v43  ;;  %v1607_v56 = vadd.f32 %v1030_v52, %v194_v44  ;;  %v946_v57 = vpop.f32.mrb[3].mxu0  ;;  %v1032_v58 = vpop.f32.mrb[3].mxu1 }
 0x17e   :  { %v1604_v61 = vadd.f32 %v946_v57, %v190_v47  ;;  %v1608_v62 = vadd.f32 %v1032_v58, %v198_v48 }
 0x17f   :  { %v1035_v63 = vpack.c.bf16 %v1603_v55, %v1601_v53  ;;  %v1037_v0 = vpack.c.bf16 %v1607_v56, %v1605_v54 }
 0x180   :  { %v1036_v1 = vpack.c.bf16 %v1604_v61, %v1602_v59  ;;  %v1038_v2 = vpack.c.bf16 %v1608_v62, %v1606_v60 }
 0x182   :  { %1334 = vmatprep.mubr.bf16.mxu0 %v1036_v1  ;;  %1375 = vmatprep.mubr.bf16.mxu1 %v1038_v2 }
 0x183   :  { %1335 = vmatmul.mubr.bf16.vlgmr.msra.gmra.mrb[4].mxu0 %v1035_v63  ;;  %1376 = vmatmul.mubr.bf16.vlgmr.msra.gmra.mrb[4].mxu1 %v1037_v0 }
 0x256   :  { %v1573_v3 = vpop.f32.mrb[4].mxu0  ;;  %v1595_v4 = vpop.f32.mrb[4].mxu1 }
 0x257   :  { %v1574_v6 = vpop.f32.mrb[5].mxu0  ;;  %v1596_v7 = vpop.f32.mrb[5].mxu1 }
 0x258   :  { %v1575_v8 = vadd.f32 %v1574_v6, %v1573_v3  ;;  %v1597_v9 = vadd.f32 %v1596_v7, %v1595_v4  ;;  %v1576_v10 = vpop.f32.mrb[6].mxu0  ;;  %v1598_v11 = vpop.f32.mrb[6].mxu1 }
 0x259   :  { %v1577_v12 = vpop.f32.mrb[7].mxu0  ;;  %v1599_v13 = vpop.f32.mrb[7].mxu1 }
 0x25a   :  { %v1337_v14 = vadd.f32 %v1575_v8, %v1524_v5  ;;  %v1578_v15 = vadd.f32 %v1577_v12, %v1576_v10  ;;  %v1600_v16 = vadd.f32 %v1599_v13, %v1598_v11 }
 0x25c   :  { %v1378_v17 = vadd.f32 %v1597_v9, %v1337_v14  ;;  %v1340_v18 = vadd.f32 %v1578_v15, %v1524_v5 }
 0x25e   :  { %1384 = vst [vmem:[%s1990_s5] sm:$0xff] %v1378_v17  ;;  %v1381_v19 = vadd.f32 %v1600_v16, %v1340_v18 }
 0x260   :  { %1385 = vst [vmem:[%s1990_s5 + $0x8] sm:$0xff] %v1381_v19 }
 0x261   :  { %1390 = vsyncpa [#allocation3], 1 }
 0x262   :  { %1391 = vsyncpa [#allocation5], 1 }

</bundles_post_ra>
